<compile_context>
chip_gen: v5e
topology: v5e:2x2
jax: 0.10.0
libtpu: 0.0.40
codegen_flags: <defaults>
</compile_context>

<pallas_src>
import jax
import jax.numpy as jnp
from jax import lax
from jax.experimental import pallas as pl
from jax.experimental.pallas import tpu as pltpu


_DEFAULT_VMEM_CAP = 64 << 20          # conservative (v7x per-TC) if query fails
_MIN_ROWS_FOR_PALLAS = 128            # below this, XLA's fused gather wins


def _vmem_capacity_bytes():
    try:
        return int(pltpu.get_tpu_info().vmem_capacity_bytes)
    except Exception:
        return _DEFAULT_VMEM_CAP


def _label_embed_kernel(eff_ref, table_ref, out_ref):
    # eff_ref:   (tb, 1) int32 effective label ids for this tile (VMEM block).
    # table_ref: (num_emb, hidden) whole embedding table, VMEM-resident.
    # out_ref:   (tb, hidden) output tile (full lane-dense block).
    tb = out_ref.shape[0]
    num_emb = table_ref.shape[0]
    ids = eff_ref[...]                                            # (tb, 1)
    cols = lax.broadcasted_iota(jnp.int32, (tb, num_emb), 1)      # (tb, num_emb)
    one_hot = (cols == ids).astype(table_ref.dtype)
    out_ref[...] = jnp.dot(
        one_hot, table_ref[...],
        preferred_element_type=jnp.float32).astype(out_ref.dtype)


def embedding_gather(eff_labels, table, *, block_rows=256,
                     min_rows_for_pallas=_MIN_ROWS_FOR_PALLAS):
    """out[i, :] = table[eff_labels[i], :] via a one-hot MXU matmul gather."""
    n = eff_labels.shape[0]
    num_emb, hidden = table.shape
    itemsize = jnp.dtype(table.dtype).itemsize
    table_bytes = num_emb * hidden * itemsize

    eff_labels = eff_labels.astype(jnp.int32)

    vmem_cap = _vmem_capacity_bytes()
    # Single-buffered resident-table budget: ~half of VMEM, capped.
    # (~32 MiB on v7x's 64 MiB, ~56 MiB on v5e/v6e's 128 MiB.)
    table_budget = min(vmem_cap // 2, 56 << 20)

    if n < min_rows_for_pallas or table_bytes > table_budget:
        # Tiny batch (pallas launch cost dominates) or table too large to hold
        # resident in VMEM: XLA's native fused gather is the right tool.
        return jnp.take(table, eff_labels, axis=0)

    tb = max(8, int(block_rows) - int(block_rows) % 8)   # multiple of sublane tile
    n_blocks = pl.cdiv(n, tb)
    n_pad = n_blocks * tb
    if n_pad != n:
        # Padded ids stay 0 (a valid row); padded output rows are sliced off.
        eff_labels = jnp.pad(eff_labels, (0, n_pad - n))
    eff_2d = eff_labels.reshape(n_pad, 1)

    # VMEM: table (single copy) + double-buffered out tile + eff tile + slack,
    # capped at 3/4 of this generation's physical VMEM.
    vmem_limit = int(min(
        (vmem_cap * 3) // 4,
        table_bytes + 2 * tb * hidden * itemsize + 2 * tb * 4 + (8 << 20)))

    out = pl.pallas_call(
        _label_embed_kernel,
        out_shape=jax.ShapeDtypeStruct((n_pad, hidden), table.dtype),
        grid=(n_blocks,),
        in_specs=[
            pl.BlockSpec((tb, 1), lambda i: (i, 0)),
            # Whole table, single-buffered, resident in VMEM for the whole grid.
            pl.BlockSpec(memory_space=pltpu.MemorySpace.VMEM),
        ],
        out_specs=pl.BlockSpec((tb, hidden), lambda i: (i, 0)),
        compiler_params=pltpu.CompilerParams(
            dimension_semantics=("parallel",),
            vmem_limit_bytes=vmem_limit,
        ),
        cost_estimate=pl.CostEstimate(
            flops=2 * n_pad * num_emb * hidden,
            transcendentals=0,
            # table read once + output written once + int32 ids read once.
            bytes_accessed=table_bytes + n_pad * hidden * itemsize + n_pad * 4),
    )(eff_2d, table)
    return out[:n]


def label_embedder_forward(labels, table, *, num_classes, dropout_prob,
                           train, key=None, force_drop_ids=None,
                           min_rows_for_pallas=_MIN_ROWS_FOR_PALLAS):
    """Mirrors LabelEmbedder.forward (token drop applied in the wrapper)."""
    n = labels.shape[0]
    labels = labels.astype(jnp.int32)
    use_dropout = dropout_prob > 0
    if (train and use_dropout) or force_drop_ids is not None:
        if table.shape[0] < num_classes + 1:
            raise ValueError(
                "Token drop requested but the embedding table has no CFG row "
                "(module must be constructed with dropout_prob > 0).")
        if force_drop_ids is None:
            if key is None:
                raise ValueError(
                    "key is required when train=True, dropout_prob>0 and "
                    "force_drop_ids is None (random label dropout).")
            drop_ids = jax.random.uniform(key, (n,)) < dropout_prob
        else:
            drop_ids = force_drop_ids == 1
        labels = jnp.where(drop_ids, num_classes, labels)
    return embedding_gather(labels, table,
                            min_rows_for_pallas=min_rows_for_pallas)


if __name__ == "__main__":
    num_classes = 10
    hidden_size = 32
    dropout_prob = 0.1          # > 0 -> CFG embedding row exists (num_classes + 1 rows)
    n = 256                     # large enough to take the Pallas path

    key = jax.random.PRNGKey(0)
    k_table, k_labels, k_drop = jax.random.split(key, 3)

    # nn.Embedding default init ~ N(0, 1); deterministic synthetic weights.
    table = jax.random.normal(
        k_table, (num_classes + 1, hidden_size), dtype=jnp.float32)
    labels = jax.random.randint(k_labels, (n,), 0, num_classes, dtype=jnp.int32)

    # Eval path (train=False): plain embedding lookup.
    out_eval = label_embedder_forward(
        labels, table, num_classes=num_classes,
        dropout_prob=dropout_prob, train=False)

    # Train path with deterministic force_drop_ids (classifier-free guidance drop).
    force_drop = (jnp.arange(n) % 4 == 0).astype(jnp.int32)
    out_cfg = label_embedder_forward(
        labels, table, num_classes=num_classes,
        dropout_prob=dropout_prob, train=True, force_drop_ids=force_drop)

    # Train path with random dropout (exercises the RNG drop mask).
    out_rand = label_embedder_forward(
        labels, table, num_classes=num_classes,
        dropout_prob=dropout_prob, train=True, key=k_drop)

    jax.block_until_ready((out_eval, out_cfg, out_rand))

    # Reference checks against plain JAX gathers.
    ref_eval = table[labels]
    ref_cfg = table[jnp.where(force_drop == 1, num_classes, labels)]
    rand_drop = jax.random.uniform(k_drop, (n,)) < dropout_prob
    ref_rand = table[jnp.where(rand_drop, num_classes, labels)]
    assert jnp.allclose(out_eval, ref_eval), "eval path mismatch"
    assert jnp.allclose(out_cfg, ref_cfg), "train/CFG-drop path mismatch"
    assert jnp.allclose(out_rand, ref_rand), "random-drop path mismatch"

    print("KERNEL_OK")
</pallas_src>

<mosaic_0001>
module attributes {stable_mosaic.version = 11 : i64} {
  func.func @_label_embed_kernel(%arg0: i32, %arg1: memref<256x1xi32, #tpu.memory_space<vmem>>, %arg2: memref<11x32xf32, #tpu.memory_space<vmem>>, %arg3: memref<256x32xf32, #tpu.memory_space<vmem>>) attributes {dimension_semantics = [#tpu.dimension_semantics<parallel>], iteration_bounds = array<i64: 1>, scalar_prefetch = 0 : i64, scratch_operands = 0 : i64, tpu.core_type = #tpu.core_type<tc>, window_params = [{transform_indices = @transform_0, window_bounds = array<i64: 256, 1>}, {pipeline_mode = #tpu.pipeline_mode<synchronous>, transform_indices = @transform_1, window_bounds = array<i64: 11, 32>}, {transform_indices = @transform_2, window_bounds = array<i64: 256, 32>}]} {
    %c0 = arith.constant 0 : index
    %c0_0 = arith.constant 0 : index
    %0 = vector.load %arg1[%c0, %c0_0] : memref<256x1xi32, #tpu.memory_space<vmem>>, vector<256x1xi32>
    %1 = tpu.iota {dimensions = array<i32: 1>} : vector<256x11xi32>
    %2 = vector.broadcast %0 : vector<256x1xi32> to vector<256x11xi32>
    %3 = arith.cmpi eq, %1, %2 : vector<256x11xi32>
    %4 = arith.extui %3 : vector<256x11xi1> to vector<256x11xi32>
    %5 = arith.sitofp %4 : vector<256x11xi32> to vector<256x11xf32>
    %c0_1 = arith.constant 0 : index
    %c0_2 = arith.constant 0 : index
    %6 = vector.load %arg2[%c0_1, %c0_2] : memref<11x32xf32, #tpu.memory_space<vmem>>, vector<11x32xf32>
    %cst = arith.constant dense<0.000000e+00> : vector<256x32xf32>
    %7 = tpu.matmul %5, %6, %cst {dimension_numbers = #tpu.dot_dimension_numbers<[1], [0], [0], [1], [0, 0, 1, 1], [], []>} : vector<256x11xf32>, vector<11x32xf32>, vector<256x32xf32> -> vector<256x32xf32>
    %c0_3 = arith.constant 0 : index
    %c0_4 = arith.constant 0 : index
    %8 = vector.load %arg3[%c0_3, %c0_4] : memref<256x32xf32, #tpu.memory_space<vmem>>, vector<256x32xf32>
    tpu.vector_store %arg3[%c0_3, %c0_4], %7 {strides = array<i32>} : memref<256x32xf32, #tpu.memory_space<vmem>>, vector<256x32xf32>,
    return
  }
  func.func @transform_0(%arg0: i32) -> (i32, i32) {
    %c0_i32 = arith.constant 0 : i32
    %c0_i32_0 = arith.constant 0 : i32
    return %arg0, %c0_i32 : i32, i32
  }
  func.func @transform_1(%arg0: i32) -> (i32, i32) {
    %c0_i32 = arith.constant 0 : i32
    %c0_i32_0 = arith.constant 0 : i32
    %c0_i32_1 = arith.constant 0 : i32
    return %c0_i32, %c0_i32_0 : i32, i32
  }
  func.func @transform_2(%arg0: i32) -> (i32, i32) {
    %c0_i32 = arith.constant 0 : i32
    %c0_i32_0 = arith.constant 0 : i32
    return %arg0, %c0_i32 : i32, i32
  }
}

</mosaic_0001>

<bundles_post_ra>
// kernel: tpu_custom_call.1
= control target key start
LH: loop header
LB: loop body
LE: loop exit
PB: predicated region body
PF: predicated region fallthrough
CT: control target
= control target key end

     0   :  { %v566_v0 = vmov 0   ;;  %vm336_vm0 = vcmask 1042432   ;;  %v43_v37 = vlaneseq  ;;  %vm239_vm1 = vcmask 89088   ;;  %s911_s0 = inlined_call_operand.vmem [shape: s32[256,1], index: 0, kind: input, shape index: {}]   ;;  %s912_s1 = inlined_call_operand.vmem [shape: f32[11,32], index: 1, kind: input, shape index: {}]   ;;  %s913_s2 = inlined_call_operand.vmem [shape: f32[256,32], index: 2, kind: output, shape index: {}]  }
   0x1   :  { %565 = vset.pattern.permute.xlu2 %v566_v0  ;;  %564 = vset.pattern.permute.xlu1 %v566_v0  ;;  %v28_v1 = vld [vmem:[%s911_s0 + $0x88] sm:$0xff]  ;;  %v27_v2 = vld [vmem:[%s911_s0 + $0x80] sm:$0xff]  ;;  %v29_v7 = vld [vmem:[%s911_s0 + $0x90] sm:$0xff]  ;;  %v567_v42 = vmov 0.0  }
   0x2   :  { %v11_v3 = vld [vmem:[%s911_s0] sm:$0xff]  ;;  %563 = vset.pattern.permute.xlu0 %v566_v0  ;;  %97 = vperm.xlu2 %565, %v28_v1   ;;  %v36_v4 = vld [vmem:[%s911_s0 + $0xc8] sm:$0xff]  ;;  %v21_v10 = vld [vmem:[%s911_s0 + $0x50] sm:$0xff]  ;;  %v685_v38 = vand.u32 127, %v43_v37 }
   0x3   :  { %94 = vperm.xlu0 %563, %v27_v2   ;;  %46 = vperm.xlu1 %564, %v11_v3   ;;  %v35_v5 = vld [vmem:[%s911_s0 + $0xc0] sm:$0xff]  ;;  %v12_v8 = vld [vmem:[%s911_s0 + $0x8] sm:$0xff]  ;;  %v37_v11 = vld [vmem:[%s911_s0 + $0xd0] sm:$0xff] }
   0x4   :  { %v19_v6 = vld [vmem:[%s911_s0 + $0x40] sm:$0xff]  ;;  %v20_v9 = vld [vmem:[%s911_s0 + $0x48] sm:$0xff]  ;;  %v13_v12 = vld [vmem:[%s911_s0 + $0x10] sm:$0xff] }
   0x5   :  { %v14_v13 = vld [vmem:[%s911_s0 + $0x18] sm:$0xff]  ;;  %v39_v16 = vld [vmem:[%s911_s0 + $0xe0] sm:$0xff]  ;;  %v32_v19 = vld [vmem:[%s911_s0 + $0xa8] sm:$0xff] }
   0x6   :  { %v30_v14 = vld [vmem:[%s911_s0 + $0x98] sm:$0xff]  ;;  %v31_v18 = vld [vmem:[%s911_s0 + $0xa0] sm:$0xff]  ;;  %v24_v22 = vld [vmem:[%s911_s0 + $0x68] sm:$0xff] }
   0x7   :  { %v38_v15 = vld [vmem:[%s911_s0 + $0xd8] sm:$0xff]  ;;  %v15_v20 = vld [vmem:[%s911_s0 + $0x20] sm:$0xff]  ;;  %v40_v23 = vld [vmem:[%s911_s0 + $0xe8] sm:$0xff] }
   0x8   :  { %v22_v17 = vld [vmem:[%s911_s0 + $0x58] sm:$0xff]  ;;  %v23_v21 = vld [vmem:[%s911_s0 + $0x60] sm:$0xff]  ;;  %v16_v24 = vld [vmem:[%s911_s0 + $0x28] sm:$0xff] }
   0x9   :  { %v17_v25 = vld [vmem:[%s911_s0 + $0x30] sm:$0xff]  ;;  %v42_v28 = vld [vmem:[%s911_s0 + $0xf8] sm:$0xff]  ;;  %v238_v31 = vld [vmem:[%s912_s1 + $0x8] sm:$0x7] }
   0xa   :  { %121 = vperm.xlu2 %565, %v36_v4   ;;  %v33_v26 = vld [vmem:[%s911_s0 + $0xb0] sm:$0xff]  ;;  %v34_v30 = vld [vmem:[%s911_s0 + $0xb8] sm:$0xff]  ;;  %522 = vmatpush.msk.msra.mxu0 %vm336_vm0, %v238_v31  ;;  %v237_v34 = vld [vmem:[%s912_s1] sm:$0xff] }
   0xb   :  { %118 = vperm.xlu0 %563, %v35_v5   ;;  %70 = vperm.xlu1 %564, %v19_v6   ;;  %v41_v27 = vld [vmem:[%s911_s0 + $0xf0] sm:$0xff]  ;;  %v18_v32 = vld [vmem:[%s911_s0 + $0x38] sm:$0xff] }
   0xc   :  { %v25_v29 = vld [vmem:[%s911_s0 + $0x70] sm:$0xff]  ;;  %556 = vmatpush.msk.msra.mxu2 %vm336_vm0, %v238_v31  ;;  %v26_v33 = vld [vmem:[%s911_s0 + $0x78] sm:$0xff]  ;;  %555 = vmatpush.msk.msra.mxu1 %vm336_vm0, %v238_v31 }
   0xd   :  { %557 = vmatpush.msk.msra.mxu3 %vm336_vm0, %v238_v31  ;;  %355 = vmatpush.msra.mxu0 %v237_v34 }
   0xe   :  { %559 = vmatpush.msra.mxu2 %v237_v34  ;;  %558 = vmatpush.msra.mxu1 %v237_v34 }
   0xf   :  { %560 = vmatpush.msra.mxu3 %v237_v34 }
  0x12   :  { %100 = vperm.xlu2 %565, %v29_v7  }
  0x13   :  { %49 = vperm.xlu0 %563, %v12_v8   ;;  %73 = vperm.xlu1 %564, %v20_v9  }
  0x1a   :  { %76 = vperm.xlu2 %565, %v21_v10  }
  0x1b   :  { %124 = vperm.xlu0 %563, %v37_v11   ;;  %52 = vperm.xlu1 %564, %v13_v12  }
  0x22   :  { %55 = vperm.xlu2 %565, %v14_v13  }
  0x23   :  { %103 = vperm.xlu0 %563, %v30_v14   ;;  %127 = vperm.xlu1 %564, %v38_v15  }
  0x2a   :  { %130 = vperm.xlu2 %565, %v39_v16  }
  0x2b   :  { %79 = vperm.xlu0 %563, %v22_v17   ;;  %106 = vperm.xlu1 %564, %v31_v18  }
  0x32   :  { %109 = vperm.xlu2 %565, %v32_v19  }
  0x33   :  { %58 = vperm.xlu0 %563, %v15_v20   ;;  %82 = vperm.xlu1 %564, %v23_v21  }
  0x3a   :  { %85 = vperm.xlu2 %565, %v24_v22  }
  0x3b   :  { %133 = vperm.xlu0 %563, %v40_v23   ;;  %61 = vperm.xlu1 %564, %v16_v24  }
  0x42   :  { %64 = vperm.xlu2 %565, %v17_v25  }
  0x43   :  { %112 = vperm.xlu0 %563, %v33_v26   ;;  %136 = vperm.xlu1 %564, %v41_v27  }
  0x4a   :  { %139 = vperm.xlu2 %565, %v42_v28  }
  0x4b   :  { %88 = vperm.xlu0 %563, %v25_v29   ;;  %115 = vperm.xlu1 %564, %v34_v30  }
  0x53   :  { %67 = vperm.xlu0 %563, %v18_v32   ;;  %91 = vperm.xlu1 %564, %v26_v33  }
  0x5c   :  { %v98_v35 = vpop.permute.xlu2 %97 }
  0x5d   :  { %vm158_vm4 = vcmp.eq.s32.totalorder %v685_v38, %v98_v35 }
  0x5e   :  { %v507_v48 = vsel %vm158_vm4, 1.0, %v567_v42 }
  0x64   :  { %v122_v36 = vpop.permute.xlu2 %121 }
  0x65   :  { %vm166_vm7 = vcmp.eq.s32.totalorder %v685_v38, %v122_v36 }
  0x66   :  { %v515_v55 = vsel %vm166_vm7, 1.0, %v567_v42 }
  0x6c   :  { %v101_v39 = vpop.permute.xlu2 %100 }
  0x6d   :  { %vm159_vm8 = vcmp.eq.s32.totalorder %v685_v38, %v101_v39 }
  0x6e   :  { %v508_v56 = vsel %vm159_vm8, 1.0, %v567_v42 }
  0x74   :  { %v77_v47 = vpop.permute.xlu2 %76 }
  0x75   :  { %v95_v40 = vpop.permute.xlu0 %94  ;;  %v47_v41 = vpop.permute.xlu1 %46  ;;  %vm151_vm11 = vcmp.eq.s32.totalorder %v685_v38, %v77_v47 }
  0x76   :  { %vm157_vm2 = vcmp.eq.s32.totalorder %v685_v38, %v95_v40  ;;  %vm141_vm3 = vcmp.eq.s32.totalorder %v685_v38, %v47_v41  ;;  %v500_v60 = vsel %vm151_vm11, 1.0, %v567_v42 }
  0x77   :  { %v506_v43 = vsel %vm157_vm2, 1.0, %v567_v42  ;;  %v490_v44 = vsel %vm141_vm3, 1.0, %v567_v42 }
  0x78   :  { %523 = vmatmul.msk.f32.vlgmr.msra.gmra.mxu0 %vm239_vm1, %v490_v44  ;;  %539 = vmatmul.msk.f32.vlgmr.msra.gmra.mxu2 %vm239_vm1, %v506_v43 }
  0x7c   :  { %v56_v57 = vpop.permute.xlu2 %55 }
  0x7d   :  { %v119_v45 = vpop.permute.xlu0 %118  ;;  %v71_v46 = vpop.permute.xlu1 %70  ;;  %vm144_vm14 = vcmp.eq.s32.totalorder %v685_v38, %v56_v57 }
  0x7e   :  { %vm165_vm5 = vcmp.eq.s32.totalorder %v685_v38, %v119_v45  ;;  %vm149_vm6 = vcmp.eq.s32.totalorder %v685_v38, %v71_v46  ;;  %v493_v2 = vsel %vm144_vm14, 1.0, %v567_v42 }
  0x7f   :  { %v514_v49 = vsel %vm165_vm5, 1.0, %v567_v42  ;;  %v498_v50 = vsel %vm149_vm6, 1.0, %v567_v42 }
  0x80   :  { %531 = vmatmul.msk.f32.vlgmr.msra.gmra.mxu1 %vm239_vm1, %v498_v50  ;;  %540 = vmatmul.msk.f32.gmra.mxu2 %vm239_vm1, %v507_v48 }
  0x81   :  { %547 = vmatmul.msk.f32.vlgmr.msra.gmra.mxu3 %vm239_vm1, %v514_v49 }
  0x84   :  { %v131_v63 = vpop.permute.xlu2 %130 }
  0x85   :  { %v50_v51 = vpop.permute.xlu0 %49  ;;  %v74_v52 = vpop.permute.xlu1 %73  ;;  %vm169_vm2 = vcmp.eq.s32.totalorder %v685_v38, %v131_v63 }
  0x86   :  { %vm142_vm9 = vcmp.eq.s32.totalorder %v685_v38, %v50_v51  ;;  %vm150_vm10 = vcmp.eq.s32.totalorder %v685_v38, %v74_v52  ;;  %v518_v10 = vsel %vm169_vm2, 1.0, %v567_v42 }
  0x87   :  { %v491_v53 = vsel %vm142_vm9, 1.0, %v567_v42  ;;  %v499_v54 = vsel %vm150_vm10, 1.0, %v567_v42 }
  0x88   :  { %524 = vmatmul.msk.f32.gmra.mxu0 %vm239_vm1, %v491_v53  ;;  %532 = vmatmul.msk.f32.gmra.mxu1 %vm239_vm1, %v499_v54 }
  0x89   :  { %541 = vmatmul.msk.f32.gmra.mxu2 %vm239_vm1, %v508_v56  ;;  %548 = vmatmul.msk.f32.gmra.mxu3 %vm239_vm1, %v515_v55 }
  0x8c   :  { %v110_v5 = vpop.permute.xlu2 %109 }
  0x8d   :  { %v125_v58 = vpop.permute.xlu0 %124  ;;  %v53_v59 = vpop.permute.xlu1 %52  ;;  %vm162_vm5 = vcmp.eq.s32.totalorder %v685_v38, %v110_v5 }
  0x8e   :  { %vm167_vm12 = vcmp.eq.s32.totalorder %v685_v38, %v125_v58  ;;  %vm143_vm13 = vcmp.eq.s32.totalorder %v685_v38, %v53_v59  ;;  %v511_v16 = vsel %vm162_vm5, 1.0, %v567_v42 }
  0x8f   :  { %v516_v61 = vsel %vm167_vm12, 1.0, %v567_v42  ;;  %v492_v62 = vsel %vm143_vm13, 1.0, %v567_v42 }
  0x90   :  { %525 = vmatmul.msk.f32.gmra.mxu0 %vm239_vm1, %v492_v62  ;;  %533 = vmatmul.msk.f32.gmra.mxu1 %vm239_vm1, %v500_v60 }
  0x91   :  { %549 = vmatmul.msk.f32.gmra.mxu3 %vm239_vm1, %v516_v61 }
  0x94   :  { %v86_v13 = vpop.permute.xlu2 %85 }
  0x95   :  { %v104_v0 = vpop.permute.xlu0 %103  ;;  %v128_v1 = vpop.permute.xlu1 %127  ;;  %vm154_vm8 = vcmp.eq.s32.totalorder %v685_v38, %v86_v13 }
  0x96   :  { %vm160_vm15 = vcmp.eq.s32.totalorder %v685_v38, %v104_v0  ;;  %vm168_vm0 = vcmp.eq.s32.totalorder %v685_v38, %v128_v1  ;;  %v503_v19 = vsel %vm154_vm8, 1.0, %v567_v42 }
  0x97   :  { %v509_v3 = vsel %vm160_vm15, 1.0, %v567_v42  ;;  %v517_v4 = vsel %vm168_vm0, 1.0, %v567_v42 }
  0x98   :  { %526 = vmatmul.msk.f32.gmra.mxu0 %vm239_vm1, %v493_v2  ;;  %542 = vmatmul.msk.f32.gmra.mxu2 %vm239_vm1, %v509_v3 }
  0x99   :  { %550 = vmatmul.msk.f32.gmra.mxu3 %vm239_vm1, %v517_v4 }
  0x9c   :  { %v65_v22 = vpop.permute.xlu2 %64 }
  0x9d   :  { %v80_v6 = vpop.permute.xlu0 %79  ;;  %v107_v7 = vpop.permute.xlu1 %106  ;;  %vm147_vm11 = vcmp.eq.s32.totalorder %v685_v38, %v65_v22 }
  0x9e   :  { %vm152_vm3 = vcmp.eq.s32.totalorder %v685_v38, %v80_v6  ;;  %vm161_vm4 = vcmp.eq.s32.totalorder %v685_v38, %v107_v7  ;;  %v496_v25 = vsel %vm147_vm11, 1.0, %v567_v42 }
  0x9f   :  { %v501_v8 = vsel %vm152_vm3, 1.0, %v567_v42  ;;  %v510_v9 = vsel %vm161_vm4, 1.0, %v567_v42  ;;  %vm453_vm4 = vcmask 261120  }
  0xa0   :  { %534 = vmatmul.msk.f32.gmra.mxu1 %vm239_vm1, %v501_v8  ;;  %543 = vmatmul.msk.f32.gmra.mxu2 %vm239_vm1, %v510_v9 }
  0xa1   :  { %551 = vmatmul.msk.f32.gmra.mxu3 %vm239_vm1, %v518_v10 }
  0xa4   :  { %v140_v28 = vpop.permute.xlu2 %139 }
  0xa5   :  { %v59_v11 = vpop.permute.xlu0 %58  ;;  %v83_v12 = vpop.permute.xlu1 %82  ;;  %vm172_vm14 = vcmp.eq.s32.totalorder %v685_v38, %v140_v28 }
  0xa6   :  { %vm145_vm6 = vcmp.eq.s32.totalorder %v685_v38, %v59_v11  ;;  %vm153_vm7 = vcmp.eq.s32.totalorder %v685_v38, %v83_v12  ;;  %v521_v33 = vsel %vm172_vm14, 1.0, %v567_v42 }
  0xa7   :  { %v494_v14 = vsel %vm145_vm6, 1.0, %v567_v42  ;;  %v502_v15 = vsel %vm153_vm7, 1.0, %v567_v42 }
  0xa8   :  { %527 = vmatmul.msk.f32.gmra.mxu0 %vm239_vm1, %v494_v14  ;;  %535 = vmatmul.msk.f32.gmra.mxu1 %vm239_vm1, %v502_v15 }
  0xa9   :  { %544 = vmatmul.msk.f32.gmra.mxu2 %vm239_vm1, %v511_v16 }
  0xad   :  { %v134_v17 = vpop.permute.xlu0 %133  ;;  %v62_v18 = vpop.permute.xlu1 %61 }
  0xae   :  { %vm170_vm9 = vcmp.eq.s32.totalorder %v685_v38, %v134_v17  ;;  %vm146_vm10 = vcmp.eq.s32.totalorder %v685_v38, %v62_v18 }
  0xaf   :  { %v519_v20 = vsel %vm170_vm9, 1.0, %v567_v42  ;;  %v495_v21 = vsel %vm146_vm10, 1.0, %v567_v42 }
  0xb0   :  { %528 = vmatmul.msk.f32.gmra.mxu0 %vm239_vm1, %v495_v21  ;;  %536 = vmatmul.msk.f32.gmra.mxu1 %vm239_vm1, %v503_v19 }
  0xb1   :  { %552 = vmatmul.msk.f32.gmra.mxu3 %vm239_vm1, %v519_v20 }
  0xb5   :  { %v113_v23 = vpop.permute.xlu0 %112  ;;  %v137_v24 = vpop.permute.xlu1 %136 }
  0xb6   :  { %vm163_vm12 = vcmp.eq.s32.totalorder %v685_v38, %v113_v23  ;;  %vm171_vm13 = vcmp.eq.s32.totalorder %v685_v38, %v137_v24 }
  0xb7   :  { %v512_v26 = vsel %vm163_vm12, 1.0, %v567_v42  ;;  %v520_v27 = vsel %vm171_vm13, 1.0, %v567_v42 }
  0xb8   :  { %529 = vmatmul.msk.f32.gmra.mxu0 %vm239_vm1, %v496_v25  ;;  %545 = vmatmul.msk.f32.gmra.mxu2 %vm239_vm1, %v512_v26 }
  0xb9   :  { %553 = vmatmul.msk.f32.gmra.mxu3 %vm239_vm1, %v520_v27 }
  0xbd   :  { %v89_v29 = vpop.permute.xlu0 %88  ;;  %v116_v30 = vpop.permute.xlu1 %115 }
  0xbe   :  { %vm155_vm15 = vcmp.eq.s32.totalorder %v685_v38, %v89_v29  ;;  %vm164_vm0 = vcmp.eq.s32.totalorder %v685_v38, %v116_v30 }
  0xbf   :  { %v504_v31 = vsel %vm155_vm15, 1.0, %v567_v42  ;;  %v513_v32 = vsel %vm164_vm0, 1.0, %v567_v42 }
  0xc0   :  { %537 = vmatmul.msk.f32.gmra.mxu1 %vm239_vm1, %v504_v31  ;;  %546 = vmatmul.msk.f32.gmra.mxu2 %vm239_vm1, %v513_v32 }
  0xc1   :  { %554 = vmatmul.msk.f32.gmra.mxu3 %vm239_vm1, %v521_v33 }
  0xc5   :  { %v68_v34 = vpop.permute.xlu0 %67  ;;  %v92_v35 = vpop.permute.xlu1 %91 }
  0xc6   :  { %vm148_vm2 = vcmp.eq.s32.totalorder %v685_v38, %v68_v34  ;;  %vm156_vm3 = vcmp.eq.s32.totalorder %v685_v38, %v92_v35 }
  0xc7   :  { %v497_v36 = vsel %vm148_vm2, 1.0, %v567_v42  ;;  %v505_v37 = vsel %vm156_vm3, 1.0, %v567_v42 }
  0xc8   :  { %530 = vmatmul.msk.f32.gmra.mxu0 %vm239_vm1, %v497_v36  ;;  %538 = vmatmul.msk.f32.gmra.mxu1 %vm239_vm1, %v505_v37 }
  0xf5   :  { %v357_v39 = vpop.f32.mrf.mxu0 }
  0xf6   :  { %454 = vst.msk [vmem:[%s913_s2] sm:$0xff] %vm453_vm4, %v357_v39 }
  0xfb   :  { %v405_v40 = vpop.f32.mrf.mxu2 }
  0xfc   :  { %470 = vst.msk [vmem:[%s913_s2 + $0x80] sm:$0xff] %vm453_vm4, %v405_v40 }
  0xfd   :  { %v381_v38 = vpop.f32.mrf.mxu1 }
  0xfe   :  { %462 = vst.msk [vmem:[%s913_s2 + $0x40] sm:$0xff] %vm453_vm4, %v381_v38 }
 0x103   :  { %v408_v41 = vpop.f32.mrf.mxu2 }
 0x104   :  { %471 = vst.msk [vmem:[%s913_s2 + $0x88] sm:$0xff] %vm453_vm4, %v408_v41  ;;  %v429_v42 = vpop.f32.mrf.mxu3 }
 0x105   :  { %478 = vst.msk [vmem:[%s913_s2 + $0xc0] sm:$0xff] %vm453_vm4, %v429_v42  ;;  %v360_v43 = vpop.f32.mrf.mxu0  ;;  %v384_v44 = vpop.f32.mrf.mxu1 }
 0x106   :  { %455 = vst.msk [vmem:[%s913_s2 + $0x8] sm:$0xff] %vm453_vm4, %v360_v43 }
 0x107   :  { %463 = vst.msk [vmem:[%s913_s2 + $0x48] sm:$0xff] %vm453_vm4, %v384_v44 }
 0x10c   :  { %v411_v45 = vpop.f32.mrf.mxu2  ;;  %v432_v46 = vpop.f32.mrf.mxu3 }
 0x10d   :  { %472 = vst.msk [vmem:[%s913_s2 + $0x90] sm:$0xff] %vm453_vm4, %v411_v45  ;;  %v363_v47 = vpop.f32.mrf.mxu0  ;;  %v387_v48 = vpop.f32.mrf.mxu1 }
 0x10e   :  { %479 = vst.msk [vmem:[%s913_s2 + $0xc8] sm:$0xff] %vm453_vm4, %v432_v46 }
 0x10f   :  { %456 = vst.msk [vmem:[%s913_s2 + $0x10] sm:$0xff] %vm453_vm4, %v363_v47 }
 0x110   :  { %464 = vst.msk [vmem:[%s913_s2 + $0x50] sm:$0xff] %vm453_vm4, %v387_v48 }
 0x114   :  { %v435_v49 = vpop.f32.mrf.mxu3 }
 0x115   :  { %480 = vst.msk [vmem:[%s913_s2 + $0xd0] sm:$0xff] %vm453_vm4, %v435_v49  ;;  %v366_v50 = vpop.f32.mrf.mxu0 }
 0x116   :  { %457 = vst.msk [vmem:[%s913_s2 + $0x18] sm:$0xff] %vm453_vm4, %v366_v50 }
 0x11b   :  { %v414_v51 = vpop.f32.mrf.mxu2 }
 0x11c   :  { %473 = vst.msk [vmem:[%s913_s2 + $0x98] sm:$0xff] %vm453_vm4, %v414_v51  ;;  %v438_v52 = vpop.f32.mrf.mxu3 }
 0x11d   :  { %481 = vst.msk [vmem:[%s913_s2 + $0xd8] sm:$0xff] %vm453_vm4, %v438_v52  ;;  %v390_v53 = vpop.f32.mrf.mxu1 }
 0x11e   :  { %465 = vst.msk [vmem:[%s913_s2 + $0x58] sm:$0xff] %vm453_vm4, %v390_v53 }
 0x123   :  { %v417_v54 = vpop.f32.mrf.mxu2 }
 0x124   :  { %474 = vst.msk [vmem:[%s913_s2 + $0xa0] sm:$0xff] %vm453_vm4, %v417_v54  ;;  %v441_v55 = vpop.f32.mrf.mxu3 }
 0x125   :  { %482 = vst.msk [vmem:[%s913_s2 + $0xe0] sm:$0xff] %vm453_vm4, %v441_v55  ;;  %v369_v56 = vpop.f32.mrf.mxu0  ;;  %v393_v57 = vpop.f32.mrf.mxu1 }
 0x126   :  { %458 = vst.msk [vmem:[%s913_s2 + $0x20] sm:$0xff] %vm453_vm4, %v369_v56 }
 0x127   :  { %466 = vst.msk [vmem:[%s913_s2 + $0x60] sm:$0xff] %vm453_vm4, %v393_v57 }
 0x12c   :  { %v420_v58 = vpop.f32.mrf.mxu2 }
 0x12d   :  { %475 = vst.msk [vmem:[%s913_s2 + $0xa8] sm:$0xff] %vm453_vm4, %v420_v58  ;;  %v372_v59 = vpop.f32.mrf.mxu0  ;;  %v396_v60 = vpop.f32.mrf.mxu1 }
 0x12e   :  { %459 = vst.msk [vmem:[%s913_s2 + $0x28] sm:$0xff] %vm453_vm4, %v372_v59 }
 0x12f   :  { %467 = vst.msk [vmem:[%s913_s2 + $0x68] sm:$0xff] %vm453_vm4, %v396_v60 }
 0x134   :  { %v444_v61 = vpop.f32.mrf.mxu3 }
 0x135   :  { %483 = vst.msk [vmem:[%s913_s2 + $0xe8] sm:$0xff] %vm453_vm4, %v444_v61  ;;  %v375_v62 = vpop.f32.mrf.mxu0 }
 0x136   :  { %460 = vst.msk [vmem:[%s913_s2 + $0x30] sm:$0xff] %vm453_vm4, %v375_v62 }
 0x13b   :  { %v423_v63 = vpop.f32.mrf.mxu2 }
 0x13c   :  { %476 = vst.msk [vmem:[%s913_s2 + $0xb0] sm:$0xff] %vm453_vm4, %v423_v63  ;;  %v447_v0 = vpop.f32.mrf.mxu3 }
 0x13d   :  { %484 = vst.msk [vmem:[%s913_s2 + $0xf0] sm:$0xff] %vm453_vm4, %v447_v0  ;;  %v399_v1 = vpop.f32.mrf.mxu1 }
 0x13e   :  { %468 = vst.msk [vmem:[%s913_s2 + $0x70] sm:$0xff] %vm453_vm4, %v399_v1 }
 0x143   :  { %v426_v2 = vpop.f32.mrf.mxu2 }
 0x144   :  { %477 = vst.msk [vmem:[%s913_s2 + $0xb8] sm:$0xff] %vm453_vm4, %v426_v2  ;;  %v450_v3 = vpop.f32.mrf.mxu3 }
 0x145   :  { %485 = vst.msk [vmem:[%s913_s2 + $0xf8] sm:$0xff] %vm453_vm4, %v450_v3  ;;  %v378_v4 = vpop.f32.mrf.mxu0  ;;  %v402_v5 = vpop.f32.mrf.mxu1 }
 0x146   :  { %461 = vst.msk [vmem:[%s913_s2 + $0x38] sm:$0xff] %vm453_vm4, %v378_v4 }
 0x147   :  { %469 = vst.msk [vmem:[%s913_s2 + $0x78] sm:$0xff] %vm453_vm4, %v402_v5 }

</bundles_post_ra>
